<compile_context>
chip_gen: v7x
topology: tpu7x:2x2x1
jax: 0.10.0
libtpu: 0.0.40
codegen_flags: <defaults>
</compile_context>

<pallas_src>
import jax
import jax.numpy as jnp
from jax.experimental import pallas as pl
from jax.experimental.pallas import tpu as pltpu

STR_LEN = 22                     # configs['str_len']
SIM_LEN = 10                     # length of whole_sim
FEATURE_LEN = SIM_LEN + STR_LEN  # configs['feature_len'] = 32
NEG_SLOPE = 0.2
MATMUL_DTYPE = jnp.bfloat16      # MXU dtype (set to jnp.float32 for bit-accurate matmuls)


def _round_up(x, m):
    return (x + m - 1) // m * m


def _leaky_relu(x, slope=NEG_SLOPE):
    # 2 VALU ops (mul+max) instead of 3 (cmp+mul+select).
    return jnp.maximum(x, slope * x)


def _make_kernel(matmul_dtype):
    F = FEATURE_LEN

    def kernel(x_ref, w_ref, b_ref, o_ref):
        # x_ref: (tb, F) f32 packed input  [whole_sim | str_feature]
        # w_ref: (6F, F) matmul-dtype weight slab [Ws1p; Ws2p; Ws3p; Wr1a; Wr1b; Wr2]
        # b_ref: (8, F)  f32 bias slab     [bs1; bs2; bs3; br1; br2; wr3_row; br3_row; 0]
        b = b_ref[...]                                        # (8, F) f32, VMEM-resident
        x = x_ref[...].astype(matmul_dtype)                   # (tb, F)

        def mm(a, i):                                         # static slab slice -> MXU matmul
            return jnp.dot(a, w_ref[i * F:(i + 1) * F, :],
                           preferred_element_type=jnp.float32)

        def cast(v):
            return v.astype(matmul_dtype)

        # --- strMlp branch (Dropout = identity at inference) ---
        h = cast(_leaky_relu(mm(x, 0) + b[0:1, :]))
        h = cast(_leaky_relu(mm(h, 1) + b[1:2, :]))
        str2vec = cast(mm(h, 2) + b[2:3, :])                  # (tb, F); cols >= STR_LEN are 0

        # --- ranking MLP; concat folded into first Linear:
        #     total @ Wr1 = x @ Wr1a_pad + str2vec @ Wr1b_pad ---
        g = cast(_leaky_relu(mm(x, 3) + mm(str2vec, 4) + b[3:4, :]))
        g = _leaky_relu(mm(g, 5) + b[4:5, :])                 # (tb, F) f32

        # --- final Linear(F, 1): VPU multiply + lane reduction ---
        logit = jnp.sum(g * b[5:6, :], axis=-1, keepdims=True) + b[6:7, 0:1]   # (tb, 1)

        # Sigmoid: exp + reciprocal both on the EUP (divide off the VALU).
        o_ref[...] = pl.reciprocal(1.0 + jnp.exp(-logit), approx=True).astype(o_ref.dtype)

    return kernel


def prepare_params(p, matmul_dtype=MATMUL_DTYPE):
    """One-time weight prep: transpose to (in,out), zero-pad to (F,F), pack into 2 slabs.

    Called ONCE outside the per-call path (prepared pytree is reused across calls).
    """
    F, S, M = FEATURE_LEN, STR_LEN, SIM_LEN

    def pad_w(w_in_out, row_off, col_off):
        out = jnp.zeros((F, F), jnp.float32)
        r, c = w_in_out.shape
        return out.at[row_off:row_off + r, col_off:col_off + c].set(w_in_out)

    # Packed input x = [whole_sim (cols 0:M) | str_feature (cols M:F)].
    ws1 = pad_w(p["ws1"].T, M, 0)          # strMlp L1 reads the str half of x
    ws2 = pad_w(p["ws2"].T, 0, 0)
    ws3 = pad_w(p["ws3"].T, 0, 0)
    wr1_t = p["wr1"].T                     # (F, F) in (in, out) layout
    wr1a = pad_w(wr1_t[:M, :], 0, 0)       # multiplies the sim half of x
    wr1b = pad_w(wr1_t[M:, :], 0, 0)       # multiplies str2vec (cols 0:S)
    wr2 = p["wr2"].T                       # (F, F)

    w_slab = jnp.concatenate([ws1, ws2, ws3, wr1a, wr1b, wr2], axis=0)   # (6F, F)
    w_slab = w_slab.astype(matmul_dtype)

    def pad_b(b_row):
        out = jnp.zeros((F,), jnp.float32)
        b_row = b_row.reshape(-1)
        return out.at[:b_row.shape[0]].set(b_row.astype(jnp.float32))

    br3 = p["br3"].reshape(-1)[0].astype(jnp.float32)
    bias_slab = jnp.stack([
        pad_b(p["bs1"]), pad_b(p["bs2"]), pad_b(p["bs3"]),
        pad_b(p["br1"]), pad_b(p["br2"]),
        pad_b(p["wr3"]),                   # F->1 weight row, used on the VPU
        jnp.full((F,), br3, jnp.float32),  # final scalar bias, broadcast across a row
        jnp.zeros((F,), jnp.float32),
    ], axis=0)                             # (8, F) f32

    return w_slab, bias_slab


def learning2rank_forward(whole_sim, str_feature, prepared, *, tile_b=512):
    """whole_sim: (B, SIM_LEN) f32, str_feature: (B, STR_LEN) f32 -> (B, 1) f32."""
    w_slab, b_slab = prepared
    b = whole_sim.shape[0]
    assert str_feature.shape[0] == b
    assert whole_sim.shape[1] == SIM_LEN and str_feature.shape[1] == STR_LEN

    # Single packed (B, F) input: halves input DMA streams vs. two separate arrays.
    x = jnp.concatenate([whole_sim.astype(jnp.float32),
                         str_feature.astype(jnp.float32)], axis=-1)

    # Tiling: grid length kept even and >= 2 (v7x megacore gets balanced work); batch
    # zero-padded to a whole number of (8,.)-aligned tiles instead of a tb=B fallback.
    num_tiles = max(2, pl.cdiv(b, tile_b))
    if num_tiles % 2:
        num_tiles += 1
    tb = _round_up(pl.cdiv(b, num_tiles), 8)
    b_pad = tb * num_tiles
    if b_pad != b:
        x = jnp.pad(x, ((0, b_pad - b), (0, 0)))

    out = pl.pallas_call(
        _make_kernel(w_slab.dtype),
        out_shape=jax.ShapeDtypeStruct((b_pad, 1), jnp.float32),
        grid=(num_tiles,),
        in_specs=[
            pl.BlockSpec((tb, FEATURE_LEN), lambda i: (i, 0)),   # packed features
            pl.BlockSpec(w_slab.shape, lambda i: (0, 0)),        # weight slab (VMEM-resident)
            pl.BlockSpec(b_slab.shape, lambda i: (0, 0)),        # bias slab   (VMEM-resident)
        ],
        out_specs=pl.BlockSpec((tb, 1), lambda i: (i, 0)),
        compiler_params=pltpu.CompilerParams(
            dimension_semantics=("parallel",)),                  # shard batch across v7x TCs
    )(x, w_slab, b_slab)
    return out[:b]


def init_params(key):
    """Deterministic synthetic init, PyTorch nn.Linear shapes (out_features, in_features)."""
    ks = jax.random.split(key, 12)

    def lin(kw, kb, out_f, in_f):
        s = 1.0 / jnp.sqrt(jnp.float32(in_f))
        return (jax.random.uniform(kw, (out_f, in_f), jnp.float32, -s, s),
                jax.random.uniform(kb, (1, out_f), jnp.float32, -s, s))

    ws1, bs1 = lin(ks[0], ks[1], STR_LEN, STR_LEN)
    ws2, bs2 = lin(ks[2], ks[3], STR_LEN, STR_LEN)
    ws3, bs3 = lin(ks[4], ks[5], STR_LEN, STR_LEN)
    wr1, br1 = lin(ks[6], ks[7], FEATURE_LEN, FEATURE_LEN)
    wr2, br2 = lin(ks[8], ks[9], FEATURE_LEN, FEATURE_LEN)
    wr3, br3 = lin(ks[10], ks[11], 1, FEATURE_LEN)
    return {"ws1": ws1, "bs1": bs1, "ws2": ws2, "bs2": bs2, "ws3": ws3, "bs3": bs3,
            "wr1": wr1, "br1": br1, "wr2": wr2, "br2": br2, "wr3": wr3, "br3": br3}


def reference_forward(whole_sim, str_feature, p):
    """Pure-JAX mirror of the PyTorch forward (eval mode) in f32."""
    lrelu = lambda v: jnp.where(v > 0, v, NEG_SLOPE * v)
    h = lrelu(str_feature @ p["ws1"].T + p["bs1"])
    h = lrelu(h @ p["ws2"].T + p["bs2"])
    str2vec = h @ p["ws3"].T + p["bs3"]
    total = jnp.concatenate([whole_sim, str2vec], axis=-1)
    g = lrelu(total @ p["wr1"].T + p["br1"])
    g = lrelu(g @ p["wr2"].T + p["br2"])
    logit = g @ p["wr3"].T + p["br3"]
    return jax.nn.sigmoid(logit)


if __name__ == "__main__":
    key = jax.random.PRNGKey(0)
    k_param, k_sim, k_str = jax.random.split(key, 3)

    params = init_params(k_param)
    prepared = prepare_params(params)          # one-time weight packing (outside per-call path)

    # 16 independent samples (each row == one PyTorch forward call).
    B = 16
    whole_sim = jax.random.normal(k_sim, (B, SIM_LEN), dtype=jnp.float32)
    str_feature = jax.random.normal(k_str, (B, STR_LEN), dtype=jnp.float32)

    out = learning2rank_forward(whole_sim, str_feature, prepared)
    out = jax.block_until_ready(out)

    ref = reference_forward(whole_sim, str_feature, params)
    assert out.shape == (B, 1)
    # Tolerance loosened because the five matmuls run in bf16 on the MXU.
    assert jnp.allclose(out, ref, atol=2e-2, rtol=2e-2), "mismatch vs reference"

    print("KERNEL_OK")
</pallas_src>

<mosaic_0001>
module attributes {stable_mosaic.version = 11 : i64} {
  func.func @kernel(%arg0: i32, %arg1: memref<8x32xf32, #tpu.memory_space<vmem>>, %arg2: memref<192x32xbf16, #tpu.memory_space<vmem>>, %arg3: memref<8x32xf32, #tpu.memory_space<vmem>>, %arg4: memref<8x1xf32, #tpu.memory_space<vmem>>) attributes {dimension_semantics = [#tpu.dimension_semantics<parallel>], iteration_bounds = array<i64: 2>, scalar_prefetch = 0 : i64, scratch_operands = 0 : i64, tpu.core_type = #tpu.core_type<tc>, window_params = [{transform_indices = @transform_0, window_bounds = array<i64: 8, 32>}, {pipeline_mode = #tpu.pipeline_mode<synchronous>, transform_indices = @transform_1, window_bounds = array<i64: 192, 32>}, {pipeline_mode = #tpu.pipeline_mode<synchronous>, transform_indices = @transform_2, window_bounds = array<i64: 8, 32>}, {transform_indices = @transform_3, window_bounds = array<i64: 8, 1>}]} {
    %c0 = arith.constant 0 : index
    %c0_0 = arith.constant 0 : index
    %0 = vector.load %arg3[%c0, %c0_0] : memref<8x32xf32, #tpu.memory_space<vmem>>, vector<8x32xf32>
    %c0_1 = arith.constant 0 : index
    %c0_2 = arith.constant 0 : index
    %1 = vector.load %arg1[%c0_1, %c0_2] : memref<8x32xf32, #tpu.memory_space<vmem>>, vector<8x32xf32>
    %2 = arith.truncf %1 : vector<8x32xf32> to vector<8x32xbf16>
    %c0_3 = arith.constant 0 : index
    %c0_4 = arith.constant 0 : index
    %3 = vector.load %arg2[%c0_3, %c0_4] : memref<192x32xbf16, #tpu.memory_space<vmem>>, vector<32x32xbf16>
    %cst = arith.constant dense<0.000000e+00> : vector<8x32xf32>
    %4 = tpu.matmul %2, %3, %cst {dimension_numbers = #tpu.dot_dimension_numbers<[1], [0], [0], [1], [0, 0, 1, 1], [], []>} : vector<8x32xbf16>, vector<32x32xbf16>, vector<8x32xf32> -> vector<8x32xf32>
    %5 = vector.extract_strided_slice %0 {offsets = [0, 0], sizes = [1, 32], strides = [1, 1]} : vector<8x32xf32> to vector<1x32xf32>
    %6 = vector.broadcast %5 : vector<1x32xf32> to vector<8x32xf32>
    %7 = arith.addf %4, %6 : vector<8x32xf32>
    %cst_5 = arith.constant 2.000000e-01 : f32
    %8 = vector.broadcast %cst_5 : f32 to vector<8x32xf32>
    %9 = arith.mulf %8, %7 : vector<8x32xf32>
    %10 = arith.maximumf %7, %9 : vector<8x32xf32>
    %11 = arith.truncf %10 : vector<8x32xf32> to vector<8x32xbf16>
    %c32 = arith.constant 32 : index
    %c0_6 = arith.constant 0 : index
    %12 = vector.load %arg2[%c32, %c0_6] : memref<192x32xbf16, #tpu.memory_space<vmem>>, vector<32x32xbf16>
    %cst_7 = arith.constant dense<0.000000e+00> : vector<8x32xf32>
    %13 = tpu.matmul %11, %12, %cst_7 {dimension_numbers = #tpu.dot_dimension_numbers<[1], [0], [0], [1], [0, 0, 1, 1], [], []>} : vector<8x32xbf16>, vector<32x32xbf16>, vector<8x32xf32> -> vector<8x32xf32>
    %14 = vector.extract_strided_slice %0 {offsets = [1, 0], sizes = [1, 32], strides = [1, 1]} : vector<8x32xf32> to vector<1x32xf32>
    %15 = vector.broadcast %14 : vector<1x32xf32> to vector<8x32xf32>
    %16 = arith.addf %13, %15 : vector<8x32xf32>
    %cst_8 = arith.constant 2.000000e-01 : f32
    %17 = vector.broadcast %cst_8 : f32 to vector<8x32xf32>
    %18 = arith.mulf %17, %16 : vector<8x32xf32>
    %19 = arith.maximumf %16, %18 : vector<8x32xf32>
    %20 = arith.truncf %19 : vector<8x32xf32> to vector<8x32xbf16>
    %c64 = arith.constant 64 : index
    %c0_9 = arith.constant 0 : index
    %21 = vector.load %arg2[%c64, %c0_9] : memref<192x32xbf16, #tpu.memory_space<vmem>>, vector<32x32xbf16>
    %cst_10 = arith.constant dense<0.000000e+00> : vector<8x32xf32>
    %22 = tpu.matmul %20, %21, %cst_10 {dimension_numbers = #tpu.dot_dimension_numbers<[1], [0], [0], [1], [0, 0, 1, 1], [], []>} : vector<8x32xbf16>, vector<32x32xbf16>, vector<8x32xf32> -> vector<8x32xf32>
    %23 = vector.extract_strided_slice %0 {offsets = [2, 0], sizes = [1, 32], strides = [1, 1]} : vector<8x32xf32> to vector<1x32xf32>
    %24 = vector.broadcast %23 : vector<1x32xf32> to vector<8x32xf32>
    %25 = arith.addf %22, %24 : vector<8x32xf32>
    %26 = arith.truncf %25 : vector<8x32xf32> to vector<8x32xbf16>
    %c96 = arith.constant 96 : index
    %c0_11 = arith.constant 0 : index
    %27 = vector.load %arg2[%c96, %c0_11] : memref<192x32xbf16, #tpu.memory_space<vmem>>, vector<32x32xbf16>
    %cst_12 = arith.constant dense<0.000000e+00> : vector<8x32xf32>
    %28 = tpu.matmul %2, %27, %cst_12 {dimension_numbers = #tpu.dot_dimension_numbers<[1], [0], [0], [1], [0, 0, 1, 1], [], []>} : vector<8x32xbf16>, vector<32x32xbf16>, vector<8x32xf32> -> vector<8x32xf32>
    %c128 = arith.constant 128 : index
    %c0_13 = arith.constant 0 : index
    %29 = vector.load %arg2[%c128, %c0_13] : memref<192x32xbf16, #tpu.memory_space<vmem>>, vector<32x32xbf16>
    %cst_14 = arith.constant dense<0.000000e+00> : vector<8x32xf32>
    %30 = tpu.matmul %26, %29, %cst_14 {dimension_numbers = #tpu.dot_dimension_numbers<[1], [0], [0], [1], [0, 0, 1, 1], [], []>} : vector<8x32xbf16>, vector<32x32xbf16>, vector<8x32xf32> -> vector<8x32xf32>
    %31 = arith.addf %28, %30 : vector<8x32xf32>
    %32 = vector.extract_strided_slice %0 {offsets = [3, 0], sizes = [1, 32], strides = [1, 1]} : vector<8x32xf32> to vector<1x32xf32>
    %33 = vector.broadcast %32 : vector<1x32xf32> to vector<8x32xf32>
    %34 = arith.addf %31, %33 : vector<8x32xf32>
    %cst_15 = arith.constant 2.000000e-01 : f32
    %35 = vector.broadcast %cst_15 : f32 to vector<8x32xf32>
    %36 = arith.mulf %35, %34 : vector<8x32xf32>
    %37 = arith.maximumf %34, %36 : vector<8x32xf32>
    %38 = arith.truncf %37 : vector<8x32xf32> to vector<8x32xbf16>
    %c160 = arith.constant 160 : index
    %c0_16 = arith.constant 0 : index
    %39 = vector.load %arg2[%c160, %c0_16] : memref<192x32xbf16, #tpu.memory_space<vmem>>, vector<32x32xbf16>
    %cst_17 = arith.constant dense<0.000000e+00> : vector<8x32xf32>
    %40 = tpu.matmul %38, %39, %cst_17 {dimension_numbers = #tpu.dot_dimension_numbers<[1], [0], [0], [1], [0, 0, 1, 1], [], []>} : vector<8x32xbf16>, vector<32x32xbf16>, vector<8x32xf32> -> vector<8x32xf32>
    %41 = vector.extract_strided_slice %0 {offsets = [4, 0], sizes = [1, 32], strides = [1, 1]} : vector<8x32xf32> to vector<1x32xf32>
    %42 = vector.broadcast %41 : vector<1x32xf32> to vector<8x32xf32>
    %43 = arith.addf %40, %42 : vector<8x32xf32>
    %cst_18 = arith.constant 2.000000e-01 : f32
    %44 = vector.broadcast %cst_18 : f32 to vector<8x32xf32>
    %45 = arith.mulf %44, %43 : vector<8x32xf32>
    %46 = arith.maximumf %43, %45 : vector<8x32xf32>
    %47 = vector.extract_strided_slice %0 {offsets = [5, 0], sizes = [1, 32], strides = [1, 1]} : vector<8x32xf32> to vector<1x32xf32>
    %48 = vector.broadcast %47 : vector<1x32xf32> to vector<8x32xf32>
    %49 = arith.mulf %46, %48 : vector<8x32xf32>
    %cst_19 = arith.constant dense<0.000000e+00> : vector<8xf32>
    %50 = vector.multi_reduction <add>, %49, %cst_19 [1] : vector<8x32xf32> to vector<8xf32>
    %51 = vector.shape_cast %50 : vector<8xf32> to vector<8x1xf32>
    %52 = vector.extract_strided_slice %0 {offsets = [6, 0], sizes = [1, 1], strides = [1, 1]} : vector<8x32xf32> to vector<1x1xf32>
    %53 = vector.broadcast %52 : vector<1x1xf32> to vector<8x1xf32>
    %54 = arith.addf %51, %53 : vector<8x1xf32>
    %cst_20 = arith.constant 0.000000e+00 : f32
    %55 = vector.broadcast %cst_20 : f32 to vector<8x1xf32>
    %56 = arith.subf %55, %54 : vector<8x1xf32>
    %57 = math.exp %56 : vector<8x1xf32>
    %cst_21 = arith.constant 1.000000e+00 : f32
    %58 = vector.broadcast %cst_21 : f32 to vector<8x1xf32>
    %59 = arith.addf %58, %57 : vector<8x1xf32>
    %60 = tpu.reciprocal %59 {approx = true} : vector<8x1xf32> -> vector<8x1xf32>
    %c0_22 = arith.constant 0 : index
    %c0_23 = arith.constant 0 : index
    %61 = vector.load %arg4[%c0_22, %c0_23] : memref<8x1xf32, #tpu.memory_space<vmem>>, vector<8x1xf32>
    tpu.vector_store %arg4[%c0_22, %c0_23], %60 {strides = array<i32>} : memref<8x1xf32, #tpu.memory_space<vmem>>, vector<8x1xf32>,
    return
  }
  func.func @transform_0(%arg0: i32) -> (i32, i32) {
    %c0_i32 = arith.constant 0 : i32
    %c0_i32_0 = arith.constant 0 : i32
    return %arg0, %c0_i32 : i32, i32
  }
  func.func @transform_1(%arg0: i32) -> (i32, i32) {
    %c0_i32 = arith.constant 0 : i32
    %c0_i32_0 = arith.constant 0 : i32
    %c0_i32_1 = arith.constant 0 : i32
    return %c0_i32, %c0_i32_0 : i32, i32
  }
  func.func @transform_2(%arg0: i32) -> (i32, i32) {
    %c0_i32 = arith.constant 0 : i32
    %c0_i32_0 = arith.constant 0 : i32
    %c0_i32_1 = arith.constant 0 : i32
    return %c0_i32, %c0_i32_0 : i32, i32
  }
  func.func @transform_3(%arg0: i32) -> (i32, i32) {
    %c0_i32 = arith.constant 0 : i32
    %c0_i32_0 = arith.constant 0 : i32
    return %arg0, %c0_i32 : i32, i32
  }
}

</mosaic_0001>

<bundles_post_ra>
// kernel: tpu_custom_call.1
= control target key start
LH: loop header
LB: loop body
LE: loop exit
PB: predicated region body
PF: predicated region fallthrough
CT: control target
= control target key end

     0   :  { %s777_s12 = smov 0   ;;  %s889_s0 = inlined_call_operand.vmem [shape: f32[16,32], index: 0, kind: input, shape index: {}]   ;;  %s890_s1 = inlined_call_operand.vmem [shape: bf16[192,32], index: 1, kind: input, shape index: {}]   ;;  %s891_s2 = inlined_call_operand.vmem [shape: f32[8,32], index: 2, kind: input, shape index: {}]   ;;  %s892_s3 = inlined_call_operand.vmem [shape: f32[16,1], index: 3, kind: output, shape index: {}]  }
   0x1 LB: > { %s628_s13 = sadd.s32 4294967295, %s753_s12   ;;  %p632_p0 = scmp.ge.s32.totalorder %s753_s12, 1  ;;  %s753_s12 = sphi %s777_s12, %s13_s12  }
   0x2   : > { %p136_p1 = scmp.lt.s32.totalorder %s753_s12, 3 }
   0x4   : > { %p137_p2 = pnand %p632_p0, %p136_p1 }
   0x5   : > { %v731_v0 = vld [vmem:[%s890_s1] sm:$0xff] (!%p137_p2)   ;;  %v755_v1 = vmov (!%p137_p2), 0.0   ;;  %v732_v2 = vld [vmem:[%s890_s1 + $0x8] sm:$0xff] (!%p137_p2)   ;;  %vm756_vm0 = vmmov (!%p137_p2), 0   ;;  %p158_p3 = scmp.lt.s32.totalorder (!%p137_p2), %s628_s13, 1  ;;  %vm190_vm1 = vcmask (!%p137_p2), 261120   ;;  %v174_v7 = vlaneseq (!%p137_p2) }
   0x6   : > { %140 = sbr.rel (%p137_p2) target bundleno = 1291 (0x50b), region = 32  ;;  %673 = vmatprep.subr.bf16.mxu0 (!%p137_p2), %v755_v1  ;;  %681 = vmatprep.subr.bf16.mxu1 (!%p137_p2), %v755_v1  ;;  %v733_v5 = vld [vmem:[%s890_s1 + $0x10] sm:$0xff] (!%p137_p2)   ;;  %v734_v6 = vld [vmem:[%s890_s1 + $0x18] sm:$0xff] (!%p137_p2)   ;;  %v824_v10 = vld [vmem:[%s891_s2] sm:$0xff] (!%p137_p2)  ;;  %vm573_vm2 = vcmask (!%p137_p2), 7168  }
   0x7   : > { %674 = vmatpush3.bf16.msra.mxu0 (!%p137_p2), %v731_v0  ;;  %677 = vmatprep.mubr.msk.bf16.mxu0 (!%p137_p2), %vm756_vm0, %v755_v1  ;;  %v818_v8 = vshrl.u32 (!%p137_p2), %v174_v7, 7  ;;  %v735_v20 = vld [vmem:[%s890_s1 + $0x20] sm:$0xff] (!%p137_p2)   ;;  %v736_v21 = vld [vmem:[%s890_s1 + $0x28] sm:$0xff] (!%p137_p2)   ;;  %v737_v32 = vld [vmem:[%s890_s1 + $0x30] sm:$0xff] (!%p137_p2)  }
   0x8   : > { %675 = vmatprep.subr.bf16.mxu0 (!%p137_p2), %v755_v1  ;;  %685 = vmatprep.mubr.msk.bf16.mxu1 (!%p137_p2), %vm756_vm0, %v755_v1  ;;  %v738_v22 = vld [vmem:[%s890_s1 + $0x40] sm:$0xff] (!%p137_p2)   ;;  %v739_v34 = vld [vmem:[%s890_s1 + $0x38] sm:$0xff] (!%p137_p2)   ;;  %v740_v35 = vld [vmem:[%s890_s1 + $0x48] sm:$0xff] (!%p137_p2)  }
   0x9   : > { %682 = vmatpush3.bf16.msra.mxu1 (!%p137_p2), %v733_v5  ;;  %v176_v9 = vsub.s32 (!%p137_p2), 0, %v818_v8  ;;  %v243_v23 = vsub.s32 (!%p137_p2), 1, %v818_v8  ;;  %v309_v36 = vsub.s32 (!%p137_p2), 2, %v818_v8  ;;  %v741_v48 = vld [vmem:[%s890_s1 + $0x50] sm:$0xff] (!%p137_p2)   ;;  %v742_v49 = vld [vmem:[%s890_s1 + $0x58] sm:$0xff] (!%p137_p2)   ;;  %v484_v50 = vsub.s32 (!%p137_p2), 3, %v818_v8 }
   0xa   : > { %683 = vmatprep.subr.bf16.mxu1 (!%p137_p2), %v755_v1  ;;  %v496_v61 = vsub.s32 (!%p137_p2), 4, %v818_v8  ;;  %v557_v63 = vsub.s32 (!%p137_p2), 5, %v818_v8 }
   0xb   : > { %676 = vmatpush3.bf16.msra.mxu0 (!%p137_p2), %v732_v2  ;;  %v177_v11 = vrot.slane (!%p137_p2), %v824_v10, %v176_v9  ;;  %v244_v24 = vrot.slane (!%p137_p2), %v824_v10, %v243_v23  ;;  %v310_v37 = vrot.slane (!%p137_p2), %v824_v10, %v309_v36  ;;  %v485_v51 = vrot.slane (!%p137_p2), %v824_v10, %v484_v50 }
   0xc   : > { %689 = vmatprep.subr.bf16.mxu0 (!%p137_p2), %v755_v1  ;;  %v497_v62 = vrot.slane (!%p137_p2), %v824_v10, %v496_v61 }
   0xd   : > { %s894_s13 = smov (!%p158_p3, %s628_s13), 1  ;;  %684 = vmatpush3.bf16.msra.mxu1 %v734_v6  ;;  %v558_v6 = vrot.slane %v824_v10, %v557_v63 }
   0xe   : > { %s633_s18 = sshll.u32 %s894_s13, 3  ;;  %697 = vmatprep.subr.bf16.mxu1 %v755_v1 }
   0xf   : > { %s161_s21 = scalar_lea.vmem %s889_s0, %s633_s18  ;;  %s165_s22 = scalar_lea.vmem %s892_s3, %s633_s18 }
  0x10   : > { %v168_v3 = vld [vmem:[%s161_s21] sm:$0xff] }
  0x11   : > { %v169_v4 = vpack.c.bf16 %v168_v3, %v168_v3 }
  0x13   : > { %678 = vmatmul.mubr.msk.bf16.vlgmr.msra.gmra.mrb[0].mxu0 %vm190_vm1, %v169_v4 }
  0x14   : > { %693 = vmatprep.mubr.msk.bf16.mxu0 %vm756_vm0, %v755_v1  ;;  %690 = vmatpush3.bf16.msra.mxu0 %v735_v20 }
  0x15   : > { %691 = vmatprep.subr.bf16.mxu0 %v755_v1 }
  0x18   : > { %692 = vmatpush3.bf16.msra.mxu0 %v736_v21 }
  0x19   : > { %705 = vmatprep.subr.bf16.mxu0 %v755_v1 }
  0xe6   : > { %v228_v12 = vpop.f32.mrb[0].mxu0 }
  0xe7   : > { %v229_v13 = vadd.f32 %v228_v12, %v177_v11  ;;  %v679_v14 = vpop.f32.mrb[1].mxu0  ;;  %v565_v12 = vsub.s32 6, %v818_v8 }
  0xe8   : > { %v231_v15 = vpop.f32.mrb[2].mxu0 }
  0xe9   : > { %v234_v16 = vmul.f32 0.2, %v229_v13  ;;  %v680_v17 = vpop.f32.mrb[3].mxu0 }
  0xeb   : > { %v235_v18 = vmax.f32 %v229_v13, %v234_v16  ;;  %v566_v13 = vrot.slane %v824_v10, %v565_v12 }
  0xed   : > { %v236_v19 = vpack.c.bf16 %v235_v18, %v235_v18 }
  0xef   : > { %686 = vmatmul.mubr.msk.bf16.vlgmr.msra.gmra.mrb[0].mxu1 %vm190_vm1, %v236_v19 }
  0xf0   : > { %701 = vmatprep.mubr.msk.bf16.mxu1 %vm756_vm0, %v755_v1  ;;  %698 = vmatpush3.bf16.msra.mxu1 %v738_v22 }
  0xf1   : > { %699 = vmatprep.subr.bf16.mxu1 %v755_v1 }
  0xf4   : > { %700 = vmatpush3.bf16.msra.mxu1 %v740_v35 }
  0xf5   : > { %713 = vmatprep.subr.bf16.mxu1 %v755_v1 }
 0x1c2   : > { %v294_v25 = vpop.f32.mrb[0].mxu1 }
 0x1c3   : > { %v295_v26 = vadd.f32 %v294_v25, %v244_v24  ;;  %v687_v27 = vpop.f32.mrb[1].mxu1 }
 0x1c4   : > { %v297_v28 = vpop.f32.mrb[2].mxu1 }
 0x1c5   : > { %v300_v29 = vmul.f32 0.2, %v295_v26  ;;  %v688_v30 = vpop.f32.mrb[3].mxu1 }
 0x1c7   : > { %v301_v31 = vmax.f32 %v295_v26, %v300_v29 }
 0x1c9   : > { %v302_v33 = vpack.c.bf16 %v301_v31, %v301_v31 }
 0x1cb   : > { %694 = vmatmul.mubr.msk.bf16.vlgmr.msra.gmra.mrb[4].mxu0 %vm190_vm1, %v302_v33 }
 0x1cc   : > { %706 = vmatpush3.bf16.msra.mxu0 %v737_v32  ;;  %709 = vmatprep.mubr.msk.bf16.mxu0 %vm756_vm0, %v755_v1 }
 0x1cd   : > { %707 = vmatprep.subr.bf16.mxu0 %v755_v1 }
 0x1d0   : > { %708 = vmatpush3.bf16.msra.mxu0 %v739_v34 }
 0x1d3   : > { %710 = vmatmul.mubr.msk.bf16.vlgmr.msra.gmra.mrb[8].mxu0 %vm190_vm1, %v169_v4 }
 0x29e   : > { %v360_v38 = vpop.f32.mrb[4].mxu0 }
 0x29f   : > { %v361_v39 = vadd.f32 %v360_v38, %v310_v37  ;;  %v695_v40 = vpop.f32.mrb[5].mxu0 }
 0x2a0   : > { %v363_v41 = vpop.f32.mrb[6].mxu0 }
 0x2a1   : > { %v366_v42 = vpack.c.bf16 %v361_v39, %v361_v39  ;;  %v696_v43 = vpop.f32.mrb[7].mxu0 }
 0x2a3   : > { %702 = vmatmul.mubr.msk.bf16.vlgmr.msra.gmra.mrb[4].mxu1 %vm190_vm1, %v366_v42 }
 0x2a4   : > { %717 = vmatprep.mubr.msk.bf16.mxu1 %vm756_vm0, %v755_v1  ;;  %714 = vmatpush3.bf16.msra.mxu1 %v741_v48 }
 0x2a5   : > { %715 = vmatprep.subr.bf16.mxu1 %v755_v1 }
 0x2a6   : > { %v476_v44 = vpop.f32.mrb[8].mxu0 }
 0x2a7   : > { %v711_v45 = vpop.f32.mrb[9].mxu0 }
 0x2a8   : > { %v479_v46 = vpop.f32.mrb[10].mxu0  ;;  %716 = vmatpush3.bf16.msra.mxu1 %v742_v49 }
 0x2a9   : > { %v712_v47 = vpop.f32.mrb[11].mxu0 }
 0x376   : > { %v424_v52 = vpop.f32.mrb[4].mxu1 }
 0x377   : > { %v477_v53 = vadd.f32 %v476_v44, %v424_v52  ;;  %v703_v54 = vpop.f32.mrb[5].mxu1 }
 0x378   : > { %v427_v55 = vpop.f32.mrb[6].mxu1 }
 0x379   : > { %v486_v56 = vadd.f32 %v485_v51, %v477_v53  ;;  %v704_v57 = vpop.f32.mrb[7].mxu1 }
 0x37b   : > { %v487_v58 = vmul.f32 0.2, %v486_v56 }
 0x37d   : > { %v488_v59 = vmax.f32 %v486_v56, %v487_v58 }
 0x37f   : > { %v489_v60 = vpack.c.bf16 %v488_v59, %v488_v59 }
 0x381   : > { %718 = vmatmul.mubr.msk.bf16.vlgmr.msra.gmra.mrb[8].mxu1 %vm190_vm1, %v489_v60 }
 0x454   : > { %v547_v0 = vpop.f32.mrb[8].mxu1 }
 0x455   : > { %v548_v1 = vadd.f32 %v547_v0, %v497_v62  ;;  %v719_v2 = vpop.f32.mrb[9].mxu1 }
 0x456   : > { %v550_v3 = vpop.f32.mrb[10].mxu1 }
 0x457   : > { %v553_v4 = vmul.f32 0.2, %v548_v1  ;;  %v720_v5 = vpop.f32.mrb[11].mxu1 }
 0x459   : > { %v554_v7 = vmax.f32 %v548_v1, %v553_v4 }
 0x45b   : > { %v559_v9 = vmul.f32 %v558_v6, %v554_v7 }
 0x45d   : > { %v560_v11 = vsel %vm190_vm1, %v559_v9, 0.0 }
 0x45e   : > { %561 = vadd.xlane.f32.xlu0 %v560_v11 }
 0x4eb   : > { %v562_v14 = vpop.xlane.xlu0 %561 }
 0x4ec   : > { %v567_v15 = vadd.f32 %v566_v13, %v562_v14 }
 0x4ee   : > { %v568_v16 = vsub.f32 0.0, %v567_v15 }
 0x4f0   : > { %v569_v17 = vmul.f32 1.442695, %v568_v16 }
 0x4f2   : > { %743 = vpow2.f32 %v569_v17 }
 0x4fc   : > { %v744_v18 = vpop.eup %743 }
 0x4fd   : > { %v571_v19 = vadd.f32 1.0, %v744_v18 }
 0x4ff   : > { %745 = vrcp.f32 %v571_v19 }
 0x509   : > { %v746_v20 = vpop.eup %745 }
 0x50a   : > { %574 = vst.msk [vmem:[%s165_s22] sm:$0xff] %vm573_vm2, %v746_v20 }
 0x50b PF: > { %s13_s12 = sadd.s32 1, %s753_s12  }
 0x50c   : > { %p10_p4 = scmp.ge.s32.totalorder %s13_s12, 4  }
 0x50e   :  { %12 = sbr.rel (!%p10_p4) target bundleno = 1 (0x1), region = 62 }

</bundles_post_ra>
